<compile_context>
chip_gen: v5e
topology: v5e:2x2
jax: 0.10.0
libtpu: 0.0.40
codegen_flags: <defaults>
</compile_context>

<pallas_src>
import jax
import jax.numpy as jnp
from jax.experimental import pallas as pl
from jax.experimental.pallas import tpu as pltpu

NEWS_DIM = 400          # hard-coded in the PyTorch module
ATT_HIDDEN = 128        # cfg.model.attention_hidden_dim (synthetic choice)


def _round_up(x, m):
    return (x + m - 1) // m * m


def _make_click_encoder_kernel(K):
    """Build the kernel for a static number of sources K (2 or 3)."""

    def kernel(*refs):
        x_refs = refs[:K]                              # K x (TN, D) f32
        w1_ref, b1_ref, w2_ref, b2_ref, o_ref, xcat_ref = refs[K:]

        xs = [r[...] for r in x_refs]                  # (TN, D) f32 each
        tn = xs[0].shape[0]

        w1 = w1_ref[...]                               # (D, H)  bf16
        b1 = b1_ref[...]                               # (1, H)  f32
        w2 = w2_ref[...]                               # (H, 1)  f32
        b2 = b2_ref[0]                                 # scalar  f32 (SMEM)

        # ---- Fused att_fc1 over all K sources: one bf16 MXU call, f32 acc.
        for k in range(K):
            xcat_ref[k * tn:(k + 1) * tn, :] = xs[k].astype(jnp.bfloat16)
        h = jnp.tanh(
            jnp.dot(xcat_ref[...], w1, preferred_element_type=jnp.float32)
            + b1)                                      # (K*TN, H) f32
        s = jnp.dot(h, w2, preferred_element_type=jnp.float32) + b2  # (K*TN,1)

        # ---- AttentionPooling normalization: exp / (sum + 1e-8), no max-sub
        # (faithful to the reference), scalarized over K.
        e = [jnp.exp(s[k * tn:(k + 1) * tn, :]) for k in range(K)]   # (TN,1)
        denom = e[0]
        for k in range(1, K):
            denom = denom + e[k]
        inv = 1.0 / (denom + 1e-8)                     # (TN, 1)

        acc = e[0] * xs[0]
        for k in range(1, K):
            acc = acc + e[k] * xs[k]
        o_ref[...] = (acc * inv).astype(o_ref.dtype)

    return kernel


def click_encoder_forward(params, clicke_title_emb, click_graph_emb,
                          click_entity_emb=None, *, row_tile=512):
    """Pallas implementation of ClickEncoder.forward.

    All *_emb inputs: (batch, num_news, NEWS_DIM) float32.
    Returns (batch, num_news, NEWS_DIM) float32.
    """
    batch, num_news, d = clicke_title_emb.shape
    assert d == NEWS_DIM

    sources = [clicke_title_emb, click_graph_emb]
    if click_entity_emb is not None:
        sources.append(click_entity_emb)
    K = len(sources)
    N = batch * num_news

    # Flatten each source to (N, D); no (N, K, D) stack is materialized.
    xs = [s.reshape(N, d).astype(jnp.float32) for s in sources]

    # Row tile: large by default, multiple of 16 (bf16 sublane packing),
    # capped by N for small inputs. Pad N up to a multiple of the tile.
    tn = min(int(row_tile), _round_up(N, 16))
    tn = max(16, _round_up(tn, 16))
    n_pad = _round_up(N, tn)
    if n_pad != N:
        xs = [jnp.pad(x, ((0, n_pad - N), (0, 0))) for x in xs]

    w1 = params["w1"].astype(jnp.bfloat16)             # (D, H) bf16 for MXU
    b1 = params["b1"].reshape(1, -1).astype(jnp.float32)   # (1, H)
    w2 = params["w2"].astype(jnp.float32)                  # (H, 1)
    b2 = params["b2"].reshape(1).astype(jnp.float32)       # (1,) SMEM scalar
    H = w1.shape[1]

    grid = (n_pad // tn,)
    kernel = _make_click_encoder_kernel(K)

    src_specs = [pl.BlockSpec((tn, d), lambda i: (i, 0)) for _ in range(K)]

    out = pl.pallas_call(
        kernel,
        out_shape=jax.ShapeDtypeStruct((n_pad, d), jnp.float32),
        grid_spec=pltpu.PrefetchScalarGridSpec(
            num_scalar_prefetch=0,
            grid=grid,
            in_specs=src_specs + [
                pl.BlockSpec((d, H), lambda i: (0, 0)),     # w1 (bf16)
                pl.BlockSpec((1, H), lambda i: (0, 0)),     # b1
                pl.BlockSpec((H, 1), lambda i: (0, 0)),     # w2
                pl.BlockSpec(memory_space=pltpu.MemorySpace.SMEM),  # b2 scalar
            ],
            out_specs=pl.BlockSpec((tn, d), lambda i: (i, 0)),
            scratch_shapes=[pltpu.VMEM((K * tn, d), jnp.bfloat16)],
        ),
        compiler_params=pltpu.CompilerParams(
            dimension_semantics=("parallel",),
            vmem_limit_bytes=48 * 1024 * 1024),
    )(*xs, w1, b1, w2, b2)

    return out[:N].reshape(batch, num_news, d)


def _reference(params, title, graph, entity=None):
    """Pure-JAX reference of ClickEncoder (for correctness check)."""
    sources = [title, graph] + ([entity] if entity is not None else [])
    b, n, d = title.shape
    x = jnp.stack(sources, axis=-2).reshape(-1, len(sources), d)
    x = x.astype(jnp.float32)
    e = jnp.tanh(x @ params["w1"] + params["b1"])          # (N, K, H)
    a = jnp.exp(e @ params["w2"] + params["b2"])           # (N, K, 1)
    a = a / (jnp.sum(a, axis=1, keepdims=True) + 1e-8)
    out = jnp.sum(a * x, axis=1)                           # (N, D)
    return out.reshape(b, n, d)


def init_params(key, news_dim=NEWS_DIM, hidden=ATT_HIDDEN):
    k1, k2, k3, k4 = jax.random.split(key, 4)
    return {
        # att_fc1: Linear(news_dim, hidden)   (stored as (D, H) for x @ W)
        "w1": jax.random.normal(k1, (news_dim, hidden), jnp.float32) * 0.05,
        "b1": jax.random.normal(k2, (hidden,), jnp.float32) * 0.01,
        # att_fc2: Linear(hidden, 1)
        "w2": jax.random.normal(k3, (hidden, 1), jnp.float32) * 0.05,
        "b2": jax.random.normal(k4, (1,), jnp.float32) * 0.01,
    }


if __name__ == "__main__":
    key = jax.random.PRNGKey(0)
    kp, kt, kg, ke = jax.random.split(key, 4)

    params = init_params(kp)

    # Small shapes (use_entity=True path, K = 3).
    batch, num_news = 2, 8
    title = jax.random.normal(kt, (batch, num_news, NEWS_DIM), jnp.float32)
    graph = jax.random.normal(kg, (batch, num_news, NEWS_DIM), jnp.float32)
    entity = jax.random.normal(ke, (batch, num_news, NEWS_DIM), jnp.float32)

    out = jax.block_until_ready(click_encoder_forward(params, title, graph, entity))
    ref = _reference(params, title, graph, entity)
    assert out.shape == (batch, num_news, NEWS_DIM)
    # bf16 MXU matmul with f32 accumulation -> a few e-3 absolute error.
    assert jnp.max(jnp.abs(out - ref)) < 5e-2

    # use_entity = False path (K = 2).
    out2 = jax.block_until_ready(click_encoder_forward(params, title, graph))
    ref2 = _reference(params, title, graph)
    assert jnp.max(jnp.abs(out2 - ref2)) < 5e-2

    # Exercise the large-tile + row-padding path (N = 800 -> padded to 1024,
    # grid length 2 at the default 512-row tile).
    kb1, kb2, kb3 = jax.random.split(key, 3)
    title_b = jax.random.normal(kb1, (4, 200, NEWS_DIM), jnp.float32)
    graph_b = jax.random.normal(kb2, (4, 200, NEWS_DIM), jnp.float32)
    entity_b = jax.random.normal(kb3, (4, 200, NEWS_DIM), jnp.float32)
    out3 = jax.block_until_ready(
        click_encoder_forward(params, title_b, graph_b, entity_b))
    ref3 = _reference(params, title_b, graph_b, entity_b)
    assert out3.shape == (4, 200, NEWS_DIM)
    assert jnp.max(jnp.abs(out3 - ref3)) < 5e-2

    print("KERNEL_OK")
</pallas_src>

<mosaic_0001>
module attributes {stable_mosaic.version = 11 : i64} {
  func.func @kernel(%arg0: i32, %arg1: memref<16x400xf32, #tpu.memory_space<vmem>>, %arg2: memref<16x400xf32, #tpu.memory_space<vmem>>, %arg3: memref<16x400xf32, #tpu.memory_space<vmem>>, %arg4: memref<400x128xbf16, #tpu.memory_space<vmem>>, %arg5: memref<1x128xf32, #tpu.memory_space<vmem>>, %arg6: memref<128x1xf32, #tpu.memory_space<vmem>>, %arg7: memref<1xf32, #tpu.memory_space<smem>>, %arg8: memref<16x400xf32, #tpu.memory_space<vmem>>, %arg9: memref<48x400xbf16, #tpu.memory_space<vmem>>) attributes {dimension_semantics = [#tpu.dimension_semantics<parallel>], iteration_bounds = array<i64: 1>, scalar_prefetch = 0 : i64, scratch_operands = 1 : i64, tpu.core_type = #tpu.core_type<tc>, window_params = [{transform_indices = @transform_0, window_bounds = array<i64: 16, 400>}, {transform_indices = @transform_1, window_bounds = array<i64: 16, 400>}, {transform_indices = @transform_2, window_bounds = array<i64: 16, 400>}, {pipeline_mode = #tpu.pipeline_mode<synchronous>, transform_indices = @transform_3, window_bounds = array<i64: 400, 128>}, {pipeline_mode = #tpu.pipeline_mode<synchronous>, transform_indices = @transform_4, window_bounds = array<i64: 1, 128>}, {pipeline_mode = #tpu.pipeline_mode<synchronous>, transform_indices = @transform_5, window_bounds = array<i64: 128, 1>}, {transform_indices = @transform_6, window_bounds = array<i64: 1>}, {transform_indices = @transform_7, window_bounds = array<i64: 16, 400>}]} {
    %c0 = arith.constant 0 : index
    %c0_0 = arith.constant 0 : index
    %0 = vector.load %arg1[%c0, %c0_0] : memref<16x400xf32, #tpu.memory_space<vmem>>, vector<16x400xf32>
    %c0_1 = arith.constant 0 : index
    %c0_2 = arith.constant 0 : index
    %1 = vector.load %arg2[%c0_1, %c0_2] : memref<16x400xf32, #tpu.memory_space<vmem>>, vector<16x400xf32>
    %c0_3 = arith.constant 0 : index
    %c0_4 = arith.constant 0 : index
    %2 = vector.load %arg3[%c0_3, %c0_4] : memref<16x400xf32, #tpu.memory_space<vmem>>, vector<16x400xf32>
    %c0_5 = arith.constant 0 : index
    %c0_6 = arith.constant 0 : index
    %3 = vector.load %arg4[%c0_5, %c0_6] : memref<400x128xbf16, #tpu.memory_space<vmem>>, vector<400x128xbf16>
    %c0_7 = arith.constant 0 : index
    %c0_8 = arith.constant 0 : index
    %4 = vector.load %arg5[%c0_7, %c0_8] : memref<1x128xf32, #tpu.memory_space<vmem>>, vector<1x128xf32>
    %c0_9 = arith.constant 0 : index
    %c0_10 = arith.constant 0 : index
    %5 = vector.load %arg6[%c0_9, %c0_10] : memref<128x1xf32, #tpu.memory_space<vmem>>, vector<128x1xf32>
    %c0_11 = arith.constant 0 : index
    %6 = memref.load %arg7[%c0_11] : memref<1xf32, #tpu.memory_space<smem>>
    %7 = arith.truncf %0 : vector<16x400xf32> to vector<16x400xbf16>
    %c0_12 = arith.constant 0 : index
    %c0_13 = arith.constant 0 : index
    %8 = vector.load %arg9[%c0_12, %c0_13] : memref<48x400xbf16, #tpu.memory_space<vmem>>, vector<16x400xbf16>
    tpu.vector_store %arg9[%c0_12, %c0_13], %7 {strides = array<i32>} : memref<48x400xbf16, #tpu.memory_space<vmem>>, vector<16x400xbf16>,
    %9 = arith.truncf %1 : vector<16x400xf32> to vector<16x400xbf16>
    %c16 = arith.constant 16 : index
    %c0_14 = arith.constant 0 : index
    %10 = vector.load %arg9[%c16, %c0_14] : memref<48x400xbf16, #tpu.memory_space<vmem>>, vector<16x400xbf16>
    tpu.vector_store %arg9[%c16, %c0_14], %9 {strides = array<i32>} : memref<48x400xbf16, #tpu.memory_space<vmem>>, vector<16x400xbf16>,
    %11 = arith.truncf %2 : vector<16x400xf32> to vector<16x400xbf16>
    %c32 = arith.constant 32 : index
    %c0_15 = arith.constant 0 : index
    %12 = vector.load %arg9[%c32, %c0_15] : memref<48x400xbf16, #tpu.memory_space<vmem>>, vector<16x400xbf16>
    tpu.vector_store %arg9[%c32, %c0_15], %11 {strides = array<i32>} : memref<48x400xbf16, #tpu.memory_space<vmem>>, vector<16x400xbf16>,
    %c0_16 = arith.constant 0 : index
    %c0_17 = arith.constant 0 : index
    %13 = vector.load %arg9[%c0_16, %c0_17] : memref<48x400xbf16, #tpu.memory_space<vmem>>, vector<48x400xbf16>
    %cst = arith.constant dense<0.000000e+00> : vector<48x128xf32>
    %14 = tpu.matmul %13, %3, %cst {dimension_numbers = #tpu.dot_dimension_numbers<[1], [0], [0], [1], [0, 0, 1, 1], [], []>} : vector<48x400xbf16>, vector<400x128xbf16>, vector<48x128xf32> -> vector<48x128xf32>
    %15 = vector.broadcast %4 : vector<1x128xf32> to vector<48x128xf32>
    %16 = arith.addf %14, %15 : vector<48x128xf32>
    %17 = math.tanh %16 : vector<48x128xf32>
    %cst_18 = arith.constant dense<0.000000e+00> : vector<48x1xf32>
    %18 = tpu.matmul %17, %5, %cst_18 {dimension_numbers = #tpu.dot_dimension_numbers<[1], [0], [0], [1], [0, 0, 1, 1], [], []>} : vector<48x128xf32>, vector<128x1xf32>, vector<48x1xf32> -> vector<48x1xf32>
    %19 = vector.broadcast %6 : f32 to vector<48x1xf32>
    %20 = arith.addf %18, %19 : vector<48x1xf32>
    %21 = vector.extract_strided_slice %20 {offsets = [0, 0], sizes = [16, 1], strides = [1, 1]} : vector<48x1xf32> to vector<16x1xf32>
    %22 = math.exp %21 : vector<16x1xf32>
    %23 = vector.extract_strided_slice %20 {offsets = [16, 0], sizes = [16, 1], strides = [1, 1]} : vector<48x1xf32> to vector<16x1xf32>
    %24 = math.exp %23 : vector<16x1xf32>
    %25 = vector.extract_strided_slice %20 {offsets = [32, 0], sizes = [16, 1], strides = [1, 1]} : vector<48x1xf32> to vector<16x1xf32>
    %26 = math.exp %25 : vector<16x1xf32>
    %27 = arith.addf %22, %24 : vector<16x1xf32>
    %28 = arith.addf %27, %26 : vector<16x1xf32>
    %cst_19 = arith.constant 9.99999993E-9 : f32
    %29 = vector.broadcast %cst_19 : f32 to vector<16x1xf32>
    %30 = arith.addf %28, %29 : vector<16x1xf32>
    %cst_20 = arith.constant 1.000000e+00 : f32
    %31 = vector.broadcast %cst_20 : f32 to vector<16x1xf32>
    %32 = arith.divf %31, %30 : vector<16x1xf32>
    %33 = vector.broadcast %22 : vector<16x1xf32> to vector<16x400xf32>
    %34 = arith.mulf %33, %0 : vector<16x400xf32>
    %35 = vector.broadcast %24 : vector<16x1xf32> to vector<16x400xf32>
    %36 = arith.mulf %35, %1 : vector<16x400xf32>
    %37 = arith.addf %34, %36 : vector<16x400xf32>
    %38 = vector.broadcast %26 : vector<16x1xf32> to vector<16x400xf32>
    %39 = arith.mulf %38, %2 : vector<16x400xf32>
    %40 = arith.addf %37, %39 : vector<16x400xf32>
    %41 = vector.broadcast %32 : vector<16x1xf32> to vector<16x400xf32>
    %42 = arith.mulf %40, %41 : vector<16x400xf32>
    %c0_21 = arith.constant 0 : index
    %c0_22 = arith.constant 0 : index
    %43 = vector.load %arg8[%c0_21, %c0_22] : memref<16x400xf32, #tpu.memory_space<vmem>>, vector<16x400xf32>
    tpu.vector_store %arg8[%c0_21, %c0_22], %42 {strides = array<i32>} : memref<16x400xf32, #tpu.memory_space<vmem>>, vector<16x400xf32>,
    return
  }
  func.func @transform_0(%arg0: i32) -> (i32, i32) {
    %c0_i32 = arith.constant 0 : i32
    %c0_i32_0 = arith.constant 0 : i32
    return %arg0, %c0_i32 : i32, i32
  }
  func.func @transform_1(%arg0: i32) -> (i32, i32) {
    %c0_i32 = arith.constant 0 : i32
    %c0_i32_0 = arith.constant 0 : i32
    return %arg0, %c0_i32 : i32, i32
  }
  func.func @transform_2(%arg0: i32) -> (i32, i32) {
    %c0_i32 = arith.constant 0 : i32
    %c0_i32_0 = arith.constant 0 : i32
    return %arg0, %c0_i32 : i32, i32
  }
  func.func @transform_3(%arg0: i32) -> (i32, i32) {
    %c0_i32 = arith.constant 0 : i32
    %c0_i32_0 = arith.constant 0 : i32
    %c0_i32_1 = arith.constant 0 : i32
    return %c0_i32, %c0_i32_0 : i32, i32
  }
  func.func @transform_4(%arg0: i32) -> (i32, i32) {
    %c0_i32 = arith.constant 0 : i32
    %c0_i32_0 = arith.constant 0 : i32
    %c0_i32_1 = arith.constant 0 : i32
    return %c0_i32, %c0_i32_0 : i32, i32
  }
  func.func @transform_5(%arg0: i32) -> (i32, i32) {
    %c0_i32 = arith.constant 0 : i32
    %c0_i32_0 = arith.constant 0 : i32
    %c0_i32_1 = arith.constant 0 : i32
    return %c0_i32, %c0_i32_0 : i32, i32
  }
  func.func @transform_6(%arg0: i32) -> i32 {
    %c0_i32 = arith.constant 0 : i32
    %c0_i32_0 = arith.constant 0 : i32
    return %c0_i32 : i32
  }
  func.func @transform_7(%arg0: i32) -> (i32, i32) {
    %c0_i32 = arith.constant 0 : i32
    %c0_i32_0 = arith.constant 0 : i32
    return %arg0, %c0_i32 : i32, i32
  }
}

</mosaic_0001>

<bundles_post_ra>
// kernel: tpu_custom_call.1
= control target key start
LH: loop header
LB: loop body
LE: loop exit
PB: predicated region body
PF: predicated region fallthrough
CT: control target
= control target key end

     0   :  { %13 = vsyncpa [#allocation5], 0  ;;  %s1318_s0 = inlined_call_operand.vmem [shape: f32[16,400], index: 0, kind: input, shape index: {}]   ;;  %s1319_s1 = inlined_call_operand.vmem [shape: f32[16,400], index: 1, kind: input, shape index: {}]   ;;  %s1320_s2 = inlined_call_operand.hbm [shape: f32[16,400], index: 2, kind: input, shape index: {}]   ;;  %s1321_s3 = inlined_call_operand.hbm [shape: bf16[400,128], index: 3, kind: input, shape index: {}]   ;;  %s1322_s4 = inlined_call_operand.vmem [shape: f32[1,128], index: 4, kind: input, shape index: {}]   ;;  %s1323_s5 = inlined_call_operand.vmem [shape: f32[128,1], index: 5, kind: input, shape index: {}]   ;;  %s1324_s6 = inlined_call_operand.<no memory space> [shape: f32[1], index: 6, kind: input, shape index: {}]   ;;  %s1325_s7 = inlined_call_operand.hbm [shape: f32[16,400], index: 7, kind: output, shape index: {}]  }
   0x1   :  { %14 = vsyncpa [#allocation8], 0 }
   0x2   :  { %15 = vsyncpa [#allocation6], 0  ;;  %s24_s26 = sshll.u32 %s1320_s2, 4  ;;  %s1036_s27 = smov [#allocation4]   ;;  %s25_s26 = int_to_ptr.hbm [resolvable:$true] %s24_s26 }
   0x3   :  { %s26_s28 = sshll.u32 %s1036_s27, 4  ;;  %s37_s8 = sshll.u32 %s1321_s3, 4  ;;  %s27_s28 = int_to_ptr.vmem [resolvable:$true] %s26_s28  ;;  %s38_s8 = int_to_ptr.hbm [resolvable:$true] %s37_s8 }
   0x4   :  { %s1037_s9 = smov 512   ;;  %s1038_s10 = smov 32  }
   0x5   :  { %32 = dma.hbm_to_vmem [thread:$0]  %s25_s26, 1024, %s27_s28, [#allocation5], %s1037_s9, %s1037_s9, %s1038_s10  }
   0x6   :  { %s1039_s11 = smov [#allocation7]   ;;  %s1040_s13 = smov 64  }
   0x7   :  { %s39_s12 = sshll.u32 %s1039_s11, 4  ;;  %s1041_s2 = smov 4   ;;  %s40_s12 = int_to_ptr.vmem [resolvable:$true] %s39_s12 }
   0x8   :  { %45 = dma.hbm_to_vmem [thread:$0]  %s38_s8, 3200, %s40_s12, [#allocation8], %s1040_s13, %s1040_s13, %s1041_s2  }
   0x9   :  { %1030 = dma.done.wait [#allocation5], 1024  }
   0xa   :  { %1031 = vsyncadd [#allocation5], 4294966272 }
   0xb   :  { %1032 = dma.done.wait [#allocation8], 3200  }
   0xc   :  { %1033 = vsyncadd [#allocation8], 4294964096  ;;  %v872_v0 = vld [vmem:[#allocation7 + $0x38] sm:$0xff]  ;;  %v871_v3 = vld [vmem:[#allocation7 + $0x30] sm:$0xff]  ;;  %vm158_vm0 = vcmask 1043456   ;;  %vm159_vm1 = vcmask 130052  }
   0xd   :  { %v880_v1 = vld [vmem:[#allocation7 + $0x78] sm:$0xff]  ;;  %412 = vmatpush.bf16.msra.mxu0 %v872_v0  ;;  %v879_v4 = vld [vmem:[#allocation7 + $0x70] sm:$0xff]  ;;  %vm1093_vm2 = vmor %vm159_vm1, %vm158_vm0  ;;  %vm402_vm3 = vcmask 130048   ;;  %s700_s11 = sshll.u32 %s1325_s7, 4  ;;  %s701_s11 = int_to_ptr.hbm [resolvable:$true] %s700_s11 }
   0xe   :  { %v888_v2 = vld [vmem:[#allocation7 + $0xb8] sm:$0xff]  ;;  %436 = vmatpush.bf16.msra.mxu1 %v880_v1  ;;  %v887_v5 = vld [vmem:[#allocation7 + $0xb0] sm:$0xff]  ;;  %v870_v7 = vld [vmem:[#allocation7 + $0x28] sm:$0xff] }
   0xf   :  { %460 = vmatpush.bf16.msra.mxu2 %v888_v2  ;;  %v878_v8 = vld [vmem:[#allocation7 + $0x68] sm:$0xff]  ;;  %v889_v9 = vld [vmem:[#allocation7 + $0xc0] sm:$0xff]  ;;  %v1100_v11 = vld [vmem:[%s1318_s0 + $0x10] sm:$0xff] }
  0x10   :  { %v886_v10 = vld [vmem:[#allocation7 + $0xa8] sm:$0xff]  ;;  %v1105_v12 = vld [vmem:[%s1318_s0 + $0x18] sm:$0xff]  ;;  %v869_v13 = vld [vmem:[#allocation7 + $0x20] sm:$0xff]  ;;  %491 = vmatpush.bf16.msra.mxu3 %v889_v9 }
  0x11   :  { %413 = vmatpush.bf16.msra.mxu0 %v871_v3  ;;  %v1110_v14 = vld [vmem:[%s1318_s0 + $0x30] sm:$0xff]  ;;  %v1115_v15 = vld [vmem:[%s1318_s0 + $0x38] sm:$0xff]  ;;  %v154_v16 = vpack.c.bf16 %v1105_v12, %v1100_v11  ;;  %v877_v17 = vld [vmem:[#allocation7 + $0x60] sm:$0xff] }
  0x12   :  { %437 = vmatpush.bf16.msra.mxu1 %v879_v4  ;;  %v885_v18 = vld [vmem:[#allocation7 + $0xa0] sm:$0xff]  ;;  %v156_v19 = vpack.c.bf16 %v1115_v15, %v1110_v14  ;;  %v1131_v21 = vld [vmem:[%s1318_s0 + $0x8] sm:$0xff]  ;;  %v1152_v26 = vld [vmem:[%s1319_s1 + $0x10] sm:$0xff] }
  0x13   :  { %461 = vmatpush.bf16.msra.mxu2 %v887_v5  ;;  %v1124_v20 = vld [vmem:[%s1318_s0] sm:$0xff]  ;;  %161 = vst.msk [vmem:[#allocation2 + $0x8] sm:$0xff] %vm1093_vm2, %v154_v16  ;;  %v1141_v23 = vld [vmem:[%s1318_s0 + $0x28] sm:$0xff]  ;;  %v1157_v27 = vld [vmem:[%s1319_s1 + $0x18] sm:$0xff] }
  0x14   :  { %v1136_v22 = vld [vmem:[%s1318_s0 + $0x20] sm:$0xff]  ;;  %163 = vst.msk [vmem:[#allocation2 + $0x18] sm:$0xff] %vm1093_vm2, %v156_v19  ;;  %v153_v24 = vpack.c.bf16 %v1131_v21, %v1124_v20  ;;  %v1162_v28 = vld [vmem:[%s1319_s1 + $0x30] sm:$0xff]  ;;  %v1167_v29 = vld [vmem:[%s1319_s1 + $0x38] sm:$0xff]  ;;  %v165_v30 = vpack.c.bf16 %v1157_v27, %v1152_v26 }
  0x15   :  { %414 = vmatpush.bf16.msra.mxu0 %v870_v7  ;;  %v155_v25 = vpack.c.bf16 %v1141_v23, %v1136_v22  ;;  %v1174_v31 = vld [vmem:[%s1319_s1] sm:$0xff]  ;;  %v1179_v32 = vld [vmem:[%s1319_s1 + $0x8] sm:$0xff]  ;;  %v167_v33 = vpack.c.bf16 %v1167_v29, %v1162_v28  ;;  %v868_v37 = vld [vmem:[#allocation7 + $0x18] sm:$0xff] }
  0x16   :  { %438 = vmatpush.bf16.msra.mxu1 %v878_v8  ;;  %157 = vst [vmem:[#allocation2] sm:$0xff] %v153_v24  ;;  %v1186_v34 = vld [vmem:[%s1319_s1 + $0x20] sm:$0xff]  ;;  %v1191_v35 = vld [vmem:[%s1319_s1 + $0x28] sm:$0xff]  ;;  %v164_v36 = vpack.c.bf16 %v1179_v32, %v1174_v31  ;;  %v876_v38 = vld [vmem:[#allocation7 + $0x58] sm:$0xff] }
  0x17   :  { %462 = vmatpush.bf16.msra.mxu2 %v886_v10  ;;  %v884_v39 = vld [vmem:[#allocation7 + $0x98] sm:$0xff]  ;;  %162 = vst [vmem:[#allocation2 + $0x10] sm:$0xff] %v155_v25  ;;  %v166_v40 = vpack.c.bf16 %v1191_v35, %v1186_v34  ;;  %v1199_v41 = vld [vmem:[#allocation4 + $0x10] sm:$0xff]  ;;  %v1218_v53 = vld [vmem:[#allocation4] sm:$0xff] }
  0x18   :  { %169 = vst.msk [vmem:[#allocation2 + $0x28] sm:$0xff] %vm1093_vm2, %v165_v30  ;;  %v1201_v42 = vld [vmem:[#allocation4 + $0x18] sm:$0xff]  ;;  %v1203_v43 = vld [vmem:[#allocation4 + $0x30] sm:$0xff]  ;;  %v866_v54 = vld [vmem:[#allocation7 + $0x8] sm:$0xff] }
  0x19   :  { %415 = vmatpush.bf16.msra.mxu0 %v869_v13  ;;  %171 = vst.msk [vmem:[#allocation2 + $0x38] sm:$0xff] %vm1093_vm2, %v167_v33  ;;  %v1207_v44 = vld [vmem:[#allocation4 + $0x38] sm:$0xff]  ;;  %v173_v45 = vpack.c.bf16 %v1201_v42, %v1199_v41  ;;  %v867_v48 = vld [vmem:[#allocation7 + $0x10] sm:$0xff]  ;;  %v874_v55 = vld [vmem:[#allocation7 + $0x48] sm:$0xff] }
  0x1a   :  { %439 = vmatpush.bf16.msra.mxu1 %v877_v17  ;;  %v891_v46 = vld [vmem:[#allocation2 + $0xc] sm:$0xf]  ;;  %168 = vst [vmem:[#allocation2 + $0x20] sm:$0xff] %v164_v36  ;;  %v175_v47 = vpack.c.bf16 %v1207_v44, %v1203_v43  ;;  %v875_v49 = vld [vmem:[#allocation7 + $0x50] sm:$0xff]  ;;  %v1222_v58 = vld [vmem:[#allocation4 + $0x20] sm:$0xff] }
  0x1b   :  { %463 = vmatpush.bf16.msra.mxu2 %v885_v18  ;;  %v726_v50 = vld [vmem:[#allocation2 + $0x18] sm:$0xf0]  ;;  %170 = vst [vmem:[#allocation2 + $0x30] sm:$0xff] %v166_v40  ;;  %v883_v51 = vld [vmem:[#allocation7 + $0x90] sm:$0xff]  ;;  %v1220_v56 = vld [vmem:[#allocation4 + $0x8] sm:$0xff] }
  0x1c   :  { %v729_v52 = vor.u32 %v891_v46, %v726_v50  ;;  %177 = vst.msk [vmem:[#allocation2 + $0x48] sm:$0xff] %vm1093_vm2, %v173_v45  ;;  %v882_v57 = vld [vmem:[#allocation7 + $0x88] sm:$0xff]  ;;  %v172_v59 = vpack.c.bf16 %v1220_v56, %v1218_v53  ;;  %v865_v61 = vld [vmem:[#allocation7] sm:$0xff]  ;;  %v893_v6 = vld [vmem:[#allocation2 + $0x14] sm:$0xf0] }
  0x1d   :  { %416 = vmatpush.bf16.msra.mxu0 %v868_v37  ;;  %179 = vst.msk [vmem:[#allocation2 + $0x58] sm:$0xff] %vm1093_vm2, %v175_v47  ;;  %v1226_v60 = vld [vmem:[#allocation4 + $0x28] sm:$0xff]  ;;  %v873_v62 = vld [vmem:[#allocation7 + $0x40] sm:$0xff]  ;;  %v151_v17 = vld [vmem:[%s1323_s5 + $0x78] sm:$0xff] }
  0x1e   :  { %440 = vmatpush.bf16.msra.mxu1 %v876_v38  ;;  %862 = vmatmul.msk.bf16.vlgmr.msra.gmra.mxu3 %vm402_vm3, %v729_v52  ;;  %v716_v63 = vld [vmem:[#allocation2] sm:$0xf]  ;;  %v174_v0 = vpack.c.bf16 %v1226_v60, %v1222_v58  ;;  %176 = vst [vmem:[#allocation2 + $0x40] sm:$0xff] %v172_v59  ;;  %v892_v1 = vld [vmem:[#allocation2 + $0xc] sm:$0xf0]  ;;  %v149_v19 = vld [vmem:[%s1323_s5 + $0x68] sm:$0xff] }
  0x1f   :  { %464 = vmatpush.bf16.msra.mxu2 %v884_v39  ;;  %v890_v2 = vld [vmem:[#allocation2 + $0x4] sm:$0xf]  ;;  %v718_v3 = vld [vmem:[#allocation2 + $0x10] sm:$0xf0]  ;;  %v724_v5 = vld [vmem:[#allocation2 + $0x8] sm:$0xf]  ;;  %v717_v7 = vor.u32 %v892_v1, %v716_v63  ;;  %902 = vmatpush.msrb.mxu3 %v151_v17 }
  0x20   :  { %v881_v4 = vld [vmem:[#allocation7 + $0x80] sm:$0xff]  ;;  %178 = vst [vmem:[#allocation2 + $0x50] sm:$0xff] %v174_v0  ;;  %v721_v8 = vor.u32 %v890_v2, %v718_v3  ;;  %v725_v9 = vor.u32 %v893_v6, %v724_v5  ;;  %v895_v10 = vld [vmem:[#allocation2 + $0x2c] sm:$0xf]  ;;  %v742_v13 = vld [vmem:[#allocation2 + $0x38] sm:$0xf0] }
  0x21   :  { %417 = vmatpush.bf16.msra.mxu0 %v867_v48  ;;  %v745_v16 = vor.u32 %v895_v10, %v742_v13  ;;  %v150_v18 = vld [vmem:[%s1323_s5 + $0x70] sm:$0xff]  ;;  %v148_v24 = vld [vmem:[%s1323_s5 + $0x60] sm:$0xff]  ;;  %v147_v25 = vld [vmem:[%s1323_s5 + $0x58] sm:$0xff] }
  0x22   :  { %441 = vmatpush.bf16.msra.mxu1 %v875_v49  ;;  %903 = vmatpush.msrb.mxu3 %v150_v18  ;;  %v732_v30 = vld [vmem:[#allocation2 + $0x20] sm:$0xf]  ;;  %v894_v33 = vld [vmem:[#allocation2 + $0x24] sm:$0xf]  ;;  %v896_v36 = vld [vmem:[#allocation2 + $0x2c] sm:$0xf0] }
  0x23   :  { %465 = vmatpush.bf16.msra.mxu2 %v883_v51  ;;  %v734_v37 = vld [vmem:[#allocation2 + $0x30] sm:$0xf0]  ;;  %v740_v39 = vld [vmem:[#allocation2 + $0x28] sm:$0xf]  ;;  %v897_v40 = vld [vmem:[#allocation2 + $0x34] sm:$0xf0]  ;;  %v733_v46 = vor.u32 %v896_v36, %v732_v30 }
  0x24   :  { %904 = vmatpush.msrb.mxu3 %v149_v19  ;;  %v146_v38 = vld [vmem:[%s1323_s5 + $0x50] sm:$0xff]  ;;  %v145_v45 = vld [vmem:[%s1323_s5 + $0x48] sm:$0xff]  ;;  %v737_v47 = vor.u32 %v894_v33, %v734_v37  ;;  %v741_v48 = vor.u32 %v897_v40, %v740_v39  ;;  %v758_v50 = vld [vmem:[#allocation2 + $0x58] sm:$0xf0] }
  0x25   :  { %418 = vmatpush.bf16.msra.mxu0 %v866_v54  ;;  %v899_v49 = vld [vmem:[#allocation2 + $0x4c] sm:$0xf]  ;;  %v144_v51 = vld [vmem:[%s1323_s5 + $0x40] sm:$0xff]  ;;  %v143_v2 = vld [vmem:[%s1323_s5 + $0x38] sm:$0xff] }
  0x26   :  { %442 = vmatpush.bf16.msra.mxu1 %v874_v55  ;;  %905 = vmatpush.msrb.mxu3 %v148_v24  ;;  %v761_v52 = vor.u32 %v899_v49, %v758_v50  ;;  %v748_v54 = vld [vmem:[#allocation2 + $0x40] sm:$0xf]  ;;  %v142_v3 = vld [vmem:[%s1323_s5 + $0x30] sm:$0xff]  ;;  %v139_v6 = vld [vmem:[%s1323_s5 + $0x18] sm:$0xff] }
  0x27   :  { %466 = vmatpush.bf16.msra.mxu2 %v882_v57  ;;  %v900_v55 = vld [vmem:[#allocation2 + $0x4c] sm:$0xf0]  ;;  %v898_v57 = vld [vmem:[#allocation2 + $0x44] sm:$0xf]  ;;  %v750_v59 = vld [vmem:[#allocation2 + $0x50] sm:$0xf0] }
  0x28   :  { %906 = vmatpush.msrb.mxu3 %v147_v25  ;;  %v749_v63 = vor.u32 %v900_v55, %v748_v54  ;;  %v753_v0 = vor.u32 %v898_v57, %v750_v59  ;;  %v140_v5 = vld [vmem:[%s1323_s5 + $0x20] sm:$0xff] }
  0x29   :  { %419 = vmatpush.bf16.msra.mxu0 %v865_v61  ;;  %v756_v61 = vld [vmem:[#allocation2 + $0x48] sm:$0xf]  ;;  %v929_v10 = vld [vmem:[%s1322_s4] ss:$0 sm:$0xff] }
  0x2a   :  { %443 = vmatpush.bf16.msra.mxu1 %v873_v62  ;;  %907 = vmatpush.msrb.mxu3 %v146_v38  ;;  %v901_v62 = vld [vmem:[#allocation2 + $0x54] sm:$0xf0] }
  0x2b   :  { %467 = vmatpush.bf16.msra.mxu2 %v881_v4  ;;  %v757_v1 = vor.u32 %v901_v62, %v756_v61  ;;  %v141_v4 = vld [vmem:[%s1323_s5 + $0x28] sm:$0xff] }
  0x2c   :  { %420 = vmatmul.bf16.vlgmr.msra.gmra.mxu0 %v717_v7  ;;  %908 = vmatpush.msrb.mxu3 %v145_v45  ;;  %v138_v7 = vld [vmem:[%s1323_s5 + $0x10] sm:$0xff] }
  0x2d   :  { %444 = vmatmul.bf16.vlgmr.msra.gmra.mxu1 %v721_v8  ;;  %515 = vmatpush.msrb.mxu0 %v151_v17  ;;  %v137_v8 = vld [vmem:[%s1323_s5 + $0x8] sm:$0xff] }
  0x2e   :  { %468 = vmatmul.bf16.vlgmr.msra.gmra.mxu2 %v725_v9  ;;  %863 = vmatmul.msk.bf16.gmra.mxu3 %vm402_vm3, %v745_v16  ;;  %v136_v9 = vld [vmem:[%s1323_s5] sm:$0xff] }
  0x2f   :  { %516 = vmatpush.msrb.mxu0 %v150_v18  ;;  %909 = vmatpush.msrb.mxu3 %v144_v51 }
  0x31   :  { %517 = vmatpush.msrb.mxu0 %v149_v19  ;;  %910 = vmatpush.msrb.mxu3 %v143_v2 }
  0x33   :  { %518 = vmatpush.msrb.mxu0 %v148_v24  ;;  %911 = vmatpush.msrb.mxu3 %v142_v3 }
  0x35   :  { %519 = vmatpush.msrb.mxu0 %v147_v25  ;;  %912 = vmatpush.msrb.mxu3 %v141_v4 }
  0x37   :  { %520 = vmatpush.msrb.mxu0 %v146_v38  ;;  %913 = vmatpush.msrb.mxu3 %v140_v5 }
  0x39   :  { %521 = vmatpush.msrb.mxu0 %v145_v45  ;;  %914 = vmatpush.msrb.mxu3 %v139_v6 }
  0x3b   :  { %522 = vmatpush.msrb.mxu0 %v144_v51  ;;  %915 = vmatpush.msrb.mxu3 %v138_v7 }
  0x3c   :  { %425 = vmatmul.bf16.gmra.mxu0 %v733_v46 }
  0x3d   :  { %449 = vmatmul.bf16.gmra.mxu1 %v737_v47  ;;  %523 = vmatpush.msrb.mxu0 %v143_v2 }
  0x3e   :  { %473 = vmatmul.bf16.gmra.mxu2 %v741_v48  ;;  %864 = vmatmul.msk.bf16.gmra.mxu3 %vm402_vm3, %v761_v52 }
  0x3f   :  { %524 = vmatpush.msrb.mxu0 %v142_v3  ;;  %916 = vmatpush.msrb.mxu3 %v137_v8 }
  0x41   :  { %525 = vmatpush.msrb.mxu0 %v141_v4  ;;  %917 = vmatpush.msrb.mxu3 %v136_v9 }
  0x43   :  { %526 = vmatpush.msrb.mxu0 %v140_v5 }
  0x45   :  { %527 = vmatpush.msrb.mxu0 %v139_v6 }
  0x47   :  { %528 = vmatpush.msrb.mxu0 %v138_v7 }
  0x49   :  { %529 = vmatpush.msrb.mxu0 %v137_v8 }
  0x4b   :  { %530 = vmatpush.msrb.mxu0 %v136_v9 }
  0x4c   :  { %430 = vmatmul.bf16.gmra.mxu0 %v749_v63 }
  0x4d   :  { %454 = vmatmul.bf16.gmra.mxu1 %v753_v0 }
  0x4e   :  { %478 = vmatmul.bf16.gmra.mxu2 %v757_v1 }
  0xa1   :  { %v493_v13 = vpop.f32.mrf.mxu3 }
  0xa9   :  { %v421_v16 = vpop.f32.mrf.mxu0  ;;  %v495_v36 = vpop.f32.mrf.mxu3 }
  0xaa   :  { %v445_v17 = vpop.f32.mrf.mxu1  ;;  %v422_v18 = vadd.f32 %v929_v10, %v421_v16 }
  0xac   :  { %v446_v19 = vadd.f32 %v445_v17, %v422_v18 }
  0xb1   :  { %v469_v24 = vpop.f32.mrf.mxu2  ;;  %v423_v30 = vpop.f32.mrf.mxu0 }
  0xb2   :  { %v470_v25 = vadd.f32 %v469_v24, %v446_v19  ;;  %v447_v33 = vpop.f32.mrf.mxu1  ;;  %v424_v38 = vadd.f32 %v929_v10, %v423_v30  ;;  %v498_v51 = vpop.f32.mrf.mxu3 }
  0xb4   :  { %v494_v37 = vadd.f32 %v493_v13, %v470_v25  ;;  %v448_v39 = vadd.f32 %v447_v33, %v424_v38 }
  0xb6   :  { %930 = vtanh.f32 %v494_v37 }
  0xb9   :  { %v471_v40 = vpop.f32.mrf.mxu2  ;;  %v426_v46 = vpop.f32.mrf.mxu0 }
  0xba   :  { %v472_v45 = vadd.f32 %v471_v40, %v448_v39  ;;  %v450_v47 = vpop.f32.mrf.mxu1  ;;  %v427_v48 = vadd.f32 %v929_v10, %v426_v46  ;;  %v500_v0 = vpop.f32.mrf.mxu3  ;;  %v1042_v46 = vmov 0  }
  0xbb   :  { %926 = vset.pattern.permute.xlu0 %v1042_v46  ;;  %927 = vset.pattern.permute.xlu1 %v1042_v46 }
  0xbc   :  { %v931_v49 = vpop.eup %930  ;;  %v496_v50 = vadd.f32 %v495_v36, %v472_v45  ;;  %v451_v52 = vadd.f32 %v450_v47, %v427_v48  ;;  %928 = vset.pattern.permute.xlu2 %v1042_v46 }
  0xbd   :  { %531 = vmatmul.f32.vlgmr.msrb.gmra.mxu0 %v931_v49 }
  0xbe   :  { %932 = vtanh.f32 %v496_v50 }
  0xc1   :  { %v474_v54 = vpop.f32.mrf.mxu2  ;;  %v428_v57 = vpop.f32.mrf.mxu0 }
  0xc2   :  { %v475_v55 = vadd.f32 %v474_v54, %v451_v52  ;;  %v452_v59 = vpop.f32.mrf.mxu1  ;;  %v429_v63 = vadd.f32 %v929_v10, %v428_v57  ;;  %v503_v13 = vpop.f32.mrf.mxu3 }
  0xc4   :  { %v933_v61 = vpop.eup %932  ;;  %v499_v62 = vadd.f32 %v498_v51, %v475_v55  ;;  %v453_v1 = vadd.f32 %v452_v59, %v429_v63 }
  0xc5   :  { %534 = vmatmul.f32.vlgmr.msrb.gmra.mxu3 %v933_v61 }
  0xc6   :  { %934 = vtanh.f32 %v499_v62 }
  0xc9   :  { %v476_v2 = vpop.f32.mrf.mxu2  ;;  %v431_v4 = vpop.f32.mrf.mxu0 }
  0xca   :  { %v477_v3 = vadd.f32 %v476_v2, %v453_v1  ;;  %v432_v5 = vadd.f32 %v929_v10, %v431_v4  ;;  %v455_v8 = vpop.f32.mrf.mxu1  ;;  %v505_v38 = vpop.f32.mrf.mxu3 }
  0xcc   :  { %v935_v6 = vpop.eup %934  ;;  %v501_v7 = vadd.f32 %v500_v0, %v477_v3  ;;  %v456_v9 = vadd.f32 %v455_v8, %v432_v5 }
  0xcd   :  { %537 = vmatmul.f32.gmra.mxu3 %v935_v6 }
  0xce   :  { %936 = vtanh.f32 %v501_v7 }
  0xd1   :  { %v479_v16 = vpop.f32.mrf.mxu2  ;;  %v433_v18 = vpop.f32.mrf.mxu0 }
  0xd2   :  { %v480_v17 = vadd.f32 %v479_v16, %v456_v9  ;;  %v434_v25 = vadd.f32 %v929_v10, %v433_v18  ;;  %v457_v30 = vpop.f32.mrf.mxu1  ;;  %v514_v10 = vstv %s1324_s6  ;;  %s1043_s6 = smov [#allocation9]  }
  0xd3   :  { %s698_s29 = sshll.u32 %s1043_s6, 4  ;;  %s699_s29 = int_to_ptr.vmem [resolvable:$true] %s698_s29 }
  0xd4   :  { %v937_v19 = vpop.eup %936  ;;  %v504_v24 = vadd.f32 %v503_v13, %v480_v17  ;;  %v458_v33 = vadd.f32 %v457_v30, %v434_v25 }
  0xd5   :  { %540 = vmatmul.f32.gmra.mxu3 %v937_v19 }
  0xd6   :  { %938 = vtanh.f32 %v504_v24 }
  0xd9   :  { %v481_v36 = vpop.f32.mrf.mxu2 }
  0xda   :  { %v482_v37 = vadd.f32 %v481_v36, %v458_v33 }
  0xdc   :  { %v939_v39 = vpop.eup %938  ;;  %v506_v40 = vadd.f32 %v505_v38, %v482_v37 }
  0xdd   :  { %543 = vmatmul.f32.gmra.mxu3 %v939_v39 }
  0xde   :  { %940 = vtanh.f32 %v506_v40 }
  0xe4   :  { %v941_v45 = vpop.eup %940 }
  0xe5   :  { %546 = vmatmul.f32.gmra.mxu3 %v941_v45 }
 0x13a   :  { %v532_v47 = vpop.f32.mrf.mxu0 }
 0x13b   :  { %v533_v48 = vadd.f32 %v532_v47, %v514_v10 }
 0x13d   :  { %v550_v49 = vmul.f32 1.442695, %v533_v48 }
 0x13f   :  { %942 = vpow2.f32 %v550_v49 }
 0x145   :  { %v943_v50 = vpop.eup %942 }
 0x146   :  { %600 = vperm.xlu0 %926, %v943_v50  }
 0x148   :  { %v535_v51 = vpop.f32.mrf.mxu3 }
 0x149   :  { %v536_v52 = vadd.f32 %v535_v51, %v514_v10 }
 0x14b   :  { %v552_v54 = vmul.f32 1.442695, %v536_v52 }
 0x14d   :  { %944 = vpow2.f32 %v552_v54 }
 0x150   :  { %v538_v55 = vpop.f32.mrf.mxu3 }
 0x151   :  { %v539_v57 = vadd.f32 %v538_v55, %v514_v10 }
 0x153   :  { %v945_v59 = vpop.eup %944  ;;  %v554_v61 = vmul.f32 1.442695, %v539_v57 }
 0x154   :  { %605 = vperm.xlu0 %926, %v945_v59  }
 0x155   :  { %946 = vpow2.f32 %v554_v61 }
 0x158   :  { %v541_v62 = vpop.f32.mrf.mxu3 }
 0x159   :  { %v542_v63 = vadd.f32 %v541_v62, %v514_v10 }
 0x15b   :  { %v947_v0 = vpop.eup %946  ;;  %v556_v1 = vmul.f32 1.442695, %v542_v63 }
 0x15c   :  { %618 = vperm.xlu1 %927, %v947_v0   ;;  %v562_v8 = vadd.f32 %v947_v0, %v943_v50 }
 0x15d   :  { %948 = vpow2.f32 %v556_v1 }
 0x160   :  { %v544_v2 = vpop.f32.mrf.mxu3 }
 0x161   :  { %v545_v3 = vadd.f32 %v544_v2, %v514_v10 }
 0x163   :  { %v949_v4 = vpop.eup %948  ;;  %v558_v5 = vmul.f32 1.442695, %v545_v3 }
 0x164   :  { %623 = vperm.xlu1 %927, %v949_v4   ;;  %v563_v18 = vadd.f32 %v949_v4, %v945_v59 }
 0x165   :  { %950 = vpow2.f32 %v558_v5 }
 0x168   :  { %v547_v6 = vpop.f32.mrf.mxu3 }
 0x169   :  { %v548_v7 = vadd.f32 %v547_v6, %v514_v10 }
 0x16b   :  { %v951_v9 = vpop.eup %950  ;;  %v560_v13 = vmul.f32 1.442695, %v548_v7 }
 0x16c   :  { %v564_v16 = vadd.f32 %v951_v9, %v562_v8  ;;  %644 = vperm.xlu2 %928, %v951_v9  }
 0x16d   :  { %952 = vpow2.f32 %v560_v13 }
 0x16e   :  { %v566_v17 = vadd.f32 1e-08, %v564_v16 }
 0x170   :  { %954 = vrcp.f32 %v566_v17  ;;  %v579_v37 = vand.u32 2147483648, %v566_v17  ;;  %v577_v39 = vand.u32 2147483647, %v566_v17  ;;  %vm573_vm5 = vweird.f32 %v566_v17 }
 0x172   :  { %v580_v46 = vor.u32 1.1754944e-38, %v579_v37  ;;  %vm578_vm7 = vcmp.eq.f32.partialorder %v577_v39, 8.507059e+37 }
 0x173   :  { %v953_v19 = vpop.eup %952 }
 0x174   :  { %v565_v24 = vadd.f32 %v953_v19, %v563_v18  ;;  %649 = vperm.xlu2 %928, %v953_v19  }
 0x176   :  { %v955_v25 = vpop.eup %954  ;;  %v567_v30 = vadd.f32 1e-08, %v565_v24 }
 0x177   :  { %v569_v33 = vmul.f32 %v955_v25, %v566_v17  ;;  %vm574_vm4 = vweird.f32 %v955_v25 }
 0x178   :  { %956 = vrcp.f32 %v567_v30  ;;  %vm575_vm6 = vmor %vm573_vm5, %vm574_vm4  ;;  %v594_v50 = vand.u32 2147483648, %v567_v30  ;;  %v592_v52 = vand.u32 2147483647, %v567_v30  ;;  %vm588_vm9 = vweird.f32 %v567_v30 }
 0x179   :  { %v570_v36 = vsub.f32 1.0, %v569_v33 }
 0x17a   :  { %v595_v55 = vor.u32 1.1754944e-38, %v594_v50  ;;  %vm593_vm11 = vcmp.eq.f32.partialorder %v592_v52, 8.507059e+37 }
 0x17b   :  { %v571_v38 = vmul.f32 %v955_v25, %v570_v36 }
 0x17d   :  { %v572_v40 = vadd.f32 %v955_v25, %v571_v38 }
 0x17e   :  { %v957_v45 = vpop.eup %956 }
 0x17f   :  { %v576_v10 = vsel %vm575_vm6, %v955_v25, %v572_v40  ;;  %v584_v47 = vmul.f32 %v957_v45, %v567_v30  ;;  %vm589_vm8 = vweird.f32 %v957_v45 }
 0x180   :  { %v581_v48 = vsel %vm578_vm7, %v580_v46, %v576_v10  ;;  %vm590_vm10 = vmor %vm588_vm9, %vm589_vm8 }
 0x181   :  { %670 = vperm.xlu0 %926, %v581_v48   ;;  %v585_v49 = vsub.f32 1.0, %v584_v47 }
 0x183   :  { %v586_v51 = vmul.f32 %v957_v45, %v585_v49 }
 0x185   :  { %v587_v54 = vadd.f32 %v957_v45, %v586_v51 }
 0x187   :  { %v591_v57 = vsel %vm590_vm10, %v957_v45, %v587_v54 }
 0x188   :  { %v596_v59 = vsel %vm593_vm11, %v595_v55, %v591_v57 }
 0x189   :  { %675 = vperm.xlu1 %927, %v596_v59  }
 0x1b8   :  { %v601_v61 = vpop.permute.xlu0 %600 }
 0x1b9   :  { %v608_v2 = vmul.f32 %v601_v61, %v1124_v20  ;;  %v609_v3 = vmul.f32 %v601_v61, %v1131_v21  ;;  %v610_v7 = vmul.f32 %v601_v61, %v1100_v11  ;;  %v611_v8 = vmul.f32 %v601_v61, %v1105_v12 }
 0x1c6   :  { %v645_v4 = vpop.permute.xlu2 %644  ;;  %v606_v5 = vpop.permute.xlu0 %605 }
 0x1c7   :  { %v654_v20 = vmul.f32 %v645_v4, %v1199_v41  ;;  %v655_v21 = vmul.f32 %v645_v4, %v1201_v42  ;;  %v612_v25 = vmul.f32 %v606_v5, %v1136_v22  ;;  %v614_v41 = vmul.f32 %v606_v5, %v1110_v14 }
 0x1ce   :  { %v619_v62 = vpop.permute.xlu1 %618  ;;  %v650_v38 = vpop.permute.xlu2 %649 }
 0x1cf   :  { %v626_v63 = vmul.f32 %v619_v62, %v1174_v31  ;;  %v627_v0 = vmul.f32 %v619_v62, %v1179_v32  ;;  %v628_v1 = vmul.f32 %v619_v62, %v1152_v26  ;;  %v629_v6 = vmul.f32 %v619_v62, %v1157_v27 }
 0x1d0   :  { %v652_v31 = vmul.f32 %v645_v4, %v1218_v53  ;;  %v653_v32 = vmul.f32 %v645_v4, %v1220_v56  ;;  %v613_v53 = vmul.f32 %v606_v5, %v1141_v23  ;;  %v656_v23 = vmul.f32 %v650_v38, %v1222_v58 }
 0x1d1   :  { %v634_v9 = vadd.f32 %v626_v63, %v608_v2  ;;  %v635_v13 = vadd.f32 %v627_v0, %v609_v3  ;;  %v636_v16 = vadd.f32 %v628_v1, %v610_v7  ;;  %v637_v17 = vadd.f32 %v629_v6, %v611_v8 }
 0x1d2   :  { %v658_v45 = vmul.f32 %v650_v38, %v1203_v43  ;;  %v659_v14 = vmul.f32 %v650_v38, %v1207_v44 }
 0x1d3   :  { %v660_v18 = vadd.f32 %v652_v31, %v634_v9  ;;  %v661_v19 = vadd.f32 %v653_v32, %v635_v13  ;;  %v662_v24 = vadd.f32 %v654_v20, %v636_v16  ;;  %v663_v30 = vadd.f32 %v655_v21, %v637_v17 }
 0x1d6   :  { %v624_v26 = vpop.permute.xlu1 %623 }
 0x1d7   :  { %v630_v27 = vmul.f32 %v624_v26, %v1186_v34  ;;  %v631_v11 = vmul.f32 %v624_v26, %v1191_v35  ;;  %v632_v12 = vmul.f32 %v624_v26, %v1162_v28  ;;  %v633_v56 = vmul.f32 %v624_v26, %v1167_v29 }
 0x1d8   :  { %v615_v34 = vmul.f32 %v606_v5, %v1115_v15  ;;  %v657_v29 = vmul.f32 %v650_v38, %v1226_v60 }
 0x1d9   :  { %v638_v28 = vadd.f32 %v630_v27, %v612_v25  ;;  %v639_v39 = vadd.f32 %v631_v11, %v613_v53  ;;  %v640_v40 = vadd.f32 %v632_v12, %v614_v41 }
 0x1da   :  { %v641_v22 = vadd.f32 %v633_v56, %v615_v34 }
 0x1db   :  { %v664_v15 = vadd.f32 %v656_v23, %v638_v28  ;;  %v665_v46 = vadd.f32 %v657_v29, %v639_v39  ;;  %v666_v10 = vadd.f32 %v658_v45, %v640_v40 }
 0x1dc   :  { %v667_v48 = vadd.f32 %v659_v14, %v641_v22 }
 0x1f3   :  { %v671_v33 = vpop.permute.xlu0 %670 }
 0x1f4   :  { %v678_v42 = vmul.f32 %v671_v33, %v660_v18  ;;  %v679_v36 = vmul.f32 %v671_v33, %v661_v19  ;;  %v680_v37 = vmul.f32 %v671_v33, %v662_v24  ;;  %v681_v35 = vmul.f32 %v671_v33, %v663_v30 }
 0x1f6   :  { %686 = vst [vmem:[#allocation9] sm:$0xff] %v678_v42 }
 0x1f7   :  { %687 = vst [vmem:[#allocation9 + $0x8] sm:$0xff] %v679_v36 }
 0x1f8   :  { %688 = vst [vmem:[#allocation9 + $0x10] sm:$0xff] %v680_v37 }
 0x1f9   :  { %689 = vst.msk [vmem:[#allocation9 + $0x18] sm:$0xff] %vm402_vm3, %v681_v35 }
 0x1fb   :  { %v676_v47 = vpop.permute.xlu1 %675 }
 0x1fc   :  { %v682_v49 = vmul.f32 %v676_v47, %v664_v15  ;;  %v683_v50 = vmul.f32 %v676_v47, %v665_v46  ;;  %v684_v51 = vmul.f32 %v676_v47, %v666_v10  ;;  %v685_v43 = vmul.f32 %v676_v47, %v667_v48 }
 0x1fe   :  { %690 = vst [vmem:[#allocation9 + $0x20] sm:$0xff] %v682_v49 }
 0x1ff   :  { %691 = vst [vmem:[#allocation9 + $0x28] sm:$0xff] %v683_v50 }
 0x200   :  { %692 = vst [vmem:[#allocation9 + $0x30] sm:$0xff] %v684_v51 }
 0x201   :  { %693 = vst.msk [vmem:[#allocation9 + $0x38] sm:$0xff] %vm402_vm3, %v685_v43 }
 0x202   :  { %706 = dma.vmem_to_hbm [thread:$0]  %s699_s29, 1024, %s701_s11, [#allocation6], %s1037_s9, %s1037_s9, %s1038_s10  }
 0x203   :  { %1034 = dma.done.wait [#allocation6], 1024  }
 0x204   :  { %1035 = vsyncadd [#allocation6], 4294966272 }
 0x205   :  { %711 = vsyncpa [#allocation5], 1 }
 0x206   :  { %712 = vsyncpa [#allocation8], 1 }
 0x207   :  { %713 = vsyncpa [#allocation6], 1 }

</bundles_post_ra>
